<compile_context>
chip_gen: v5e
topology: v5e:2x2
jax: 0.10.0
libtpu: 0.0.40
codegen_flags: <defaults>
</compile_context>

<pallas_src>
import functools

import jax
import jax.numpy as jnp
from jax.experimental import pallas as pl
from jax.experimental.pallas import tpu as pltpu

# ----------------------------- model dims ------------------------------------
Z_DIM   = 10      # input latent dim
HIDDEN  = 32      # hidden_dim
OUT_PAD = 128     # logits padded to a full lane width (real output width = 1)
BN_EPS  = 1e-5


# ------------------------------ Pallas kernel --------------------------------
def _binary_cell_kernel(x_ref, w1_ref, b1_ref, w2_ref, b2_ref, o_ref):
    f32 = jnp.float32
    # linear_1 + ReLU
    h = jax.nn.relu(
        jnp.dot(x_ref[...], w1_ref[...], preferred_element_type=f32) + b1_ref[...]
    )
    # bn1 (eval) + dropout (identity) + linear_2 are folded into (w2, b2);
    # sigmoid on the EUP. Output is lane-dense (TB, 128) -> unmasked store.
    logits = jnp.dot(h, w2_ref[...], preferred_element_type=f32) + b2_ref[...]
    o_ref[...] = jax.nn.sigmoid(logits)


# -------------------------------- wrapper -------------------------------------
def _round_up(n, m):
    return ((n + m - 1) // m) * m


@functools.partial(jax.jit, static_argnames=())
def binary_cell_states_forward(x, params):
    """Mirrors BinaryCellStatesClass.forward in eval mode. Returns (B, 1)."""
    x = x.astype(jnp.float32)
    B = x.shape[0]

    # --- fold BatchNorm1d (eval) affine into linear_2 (done once, in XLA) ---
    scale = params["gamma"] * jax.lax.rsqrt(params["running_var"] + BN_EPS)   # (H,)
    shift = params["beta"] - params["running_mean"] * scale                   # (H,)
    w2_f = params["w2"] * scale[:, None]                                      # (H, 1)
    b2_f = params["b2"] + shift @ params["w2"]                                # (1,)

    # pad linear_2 to a lane-dense 128-wide output (extra columns are zero)
    w2_pad = jnp.zeros((HIDDEN, OUT_PAD), jnp.float32).at[:, :1].set(w2_f)
    b2_pad = jnp.zeros((1, OUT_PAD), jnp.float32).at[:, :1].set(b2_f[None, :])

    b1 = params["b1"].reshape(1, HIDDEN)

    # --- batch tiling: >=128-row tiles when batch is large, 8-aligned else ---
    TB = 128 if B >= 128 else _round_up(B, 8)
    B_pad = _round_up(B, TB)
    if B_pad != B:
        x = jnp.pad(x, ((0, B_pad - B), (0, 0)))
    grid = (B_pad // TB,)

    out = pl.pallas_call(
        _binary_cell_kernel,
        out_shape=jax.ShapeDtypeStruct((B_pad, OUT_PAD), jnp.float32),
        grid=grid,
        in_specs=[
            pl.BlockSpec((TB, Z_DIM), lambda i: (i, 0)),        # x: tiled on batch
            pl.BlockSpec((Z_DIM, HIDDEN), lambda i: (0, 0)),    # w1: resident
            pl.BlockSpec((1, HIDDEN), lambda i: (0, 0)),        # b1: resident
            pl.BlockSpec((HIDDEN, OUT_PAD), lambda i: (0, 0)),  # w2 (BN-folded, padded)
            pl.BlockSpec((1, OUT_PAD), lambda i: (0, 0)),       # b2 (BN-folded, padded)
        ],
        out_specs=pl.BlockSpec((TB, OUT_PAD), lambda i: (i, 0)),
        compiler_params=pltpu.CompilerParams(
            dimension_semantics=("parallel",)),                 # v7x: 2 TCs share batch
    )(x, params["w1"], b1, w2_pad, b2_pad)

    return out[:B, :1]


# --------------------------- deterministic params ------------------------------
def init_params(key):
    k1, k2, k3, k4, k5 = jax.random.split(key, 5)
    return {
        "w1": jax.random.normal(k1, (Z_DIM, HIDDEN), jnp.float32) / jnp.sqrt(Z_DIM),
        "b1": 0.1 * jax.random.normal(k2, (HIDDEN,), jnp.float32),
        "gamma": 1.0 + 0.1 * jax.random.normal(k3, (HIDDEN,), jnp.float32),
        "beta": 0.1 * jax.random.normal(k4, (HIDDEN,), jnp.float32),
        "running_mean": 0.05 * jax.random.normal(k5, (HIDDEN,), jnp.float32),
        "running_var": jnp.abs(
            1.0 + 0.1 * jax.random.normal(k5, (HIDDEN,), jnp.float32)),
        "w2": jax.random.normal(k1, (HIDDEN, 1), jnp.float32) / jnp.sqrt(HIDDEN),
        "b2": jnp.zeros((1,), jnp.float32),
    }


# ----------------------------- pure-JAX reference ------------------------------
def reference_forward(x, p):
    x = x.astype(jnp.float32)
    h = jax.nn.relu(x @ p["w1"] + p["b1"])                               # linear_1 + relu
    h = p["gamma"] * (h - p["running_mean"]) \
        / jnp.sqrt(p["running_var"] + BN_EPS) + p["beta"]                # bn1 (eval)
    # dropout1: identity in eval mode
    return jax.nn.sigmoid(h @ p["w2"] + p["b2"])                         # linear_2 + sigmoid


# ------------------------------------ main --------------------------------------
if __name__ == "__main__":
    key = jax.random.PRNGKey(0)
    kp, kx = jax.random.split(key)

    params = init_params(kp)
    x = jax.random.normal(kx, (16, Z_DIM), jnp.float32)   # small batch demo

    y = binary_cell_states_forward(x, params)
    y = jax.block_until_ready(y)

    ref = reference_forward(x, params)
    assert y.shape == (16, 1)
    assert bool(jnp.allclose(y, ref, atol=1e-4, rtol=1e-4)), (y, ref)

    print("KERNEL_OK")
</pallas_src>

<mosaic_0001>
module attributes {stable_mosaic.version = 11 : i64} {
  func.func @_binary_cell_kernel(%arg0: i32, %arg1: memref<16x10xf32, #tpu.memory_space<vmem>>, %arg2: memref<10x32xf32, #tpu.memory_space<vmem>>, %arg3: memref<1x32xf32, #tpu.memory_space<vmem>>, %arg4: memref<32x128xf32, #tpu.memory_space<vmem>>, %arg5: memref<1x128xf32, #tpu.memory_space<vmem>>, %arg6: memref<16x128xf32, #tpu.memory_space<vmem>>) attributes {dimension_semantics = [#tpu.dimension_semantics<parallel>], iteration_bounds = array<i64: 1>, scalar_prefetch = 0 : i64, scratch_operands = 0 : i64, tpu.core_type = #tpu.core_type<tc>, window_params = [{transform_indices = @transform_0, window_bounds = array<i64: 16, 10>}, {pipeline_mode = #tpu.pipeline_mode<synchronous>, transform_indices = @transform_1, window_bounds = array<i64: 10, 32>}, {pipeline_mode = #tpu.pipeline_mode<synchronous>, transform_indices = @transform_2, window_bounds = array<i64: 1, 32>}, {pipeline_mode = #tpu.pipeline_mode<synchronous>, transform_indices = @transform_3, window_bounds = array<i64: 32, 128>}, {pipeline_mode = #tpu.pipeline_mode<synchronous>, transform_indices = @transform_4, window_bounds = array<i64: 1, 128>}, {transform_indices = @transform_5, window_bounds = array<i64: 16, 128>}]} {
    %c0 = arith.constant 0 : index
    %c0_0 = arith.constant 0 : index
    %0 = vector.load %arg1[%c0, %c0_0] : memref<16x10xf32, #tpu.memory_space<vmem>>, vector<16x10xf32>
    %c0_1 = arith.constant 0 : index
    %c0_2 = arith.constant 0 : index
    %1 = vector.load %arg2[%c0_1, %c0_2] : memref<10x32xf32, #tpu.memory_space<vmem>>, vector<10x32xf32>
    %cst = arith.constant dense<0.000000e+00> : vector<16x32xf32>
    %2 = tpu.matmul %0, %1, %cst {dimension_numbers = #tpu.dot_dimension_numbers<[1], [0], [0], [1], [0, 0, 1, 1], [], []>} : vector<16x10xf32>, vector<10x32xf32>, vector<16x32xf32> -> vector<16x32xf32>
    %c0_3 = arith.constant 0 : index
    %c0_4 = arith.constant 0 : index
    %3 = vector.load %arg3[%c0_3, %c0_4] : memref<1x32xf32, #tpu.memory_space<vmem>>, vector<1x32xf32>
    %4 = vector.broadcast %3 : vector<1x32xf32> to vector<16x32xf32>
    %5 = arith.addf %2, %4 : vector<16x32xf32>
    %cst_5 = arith.constant 0.000000e+00 : f32
    %6 = vector.broadcast %cst_5 : f32 to vector<16x32xf32>
    %7 = arith.maximumf %5, %6 : vector<16x32xf32>
    %c0_6 = arith.constant 0 : index
    %c0_7 = arith.constant 0 : index
    %8 = vector.load %arg4[%c0_6, %c0_7] : memref<32x128xf32, #tpu.memory_space<vmem>>, vector<32x128xf32>
    %cst_8 = arith.constant dense<0.000000e+00> : vector<16x128xf32>
    %9 = tpu.matmul %7, %8, %cst_8 {dimension_numbers = #tpu.dot_dimension_numbers<[1], [0], [0], [1], [0, 0, 1, 1], [], []>} : vector<16x32xf32>, vector<32x128xf32>, vector<16x128xf32> -> vector<16x128xf32>
    %c0_9 = arith.constant 0 : index
    %c0_10 = arith.constant 0 : index
    %10 = vector.load %arg5[%c0_9, %c0_10] : memref<1x128xf32, #tpu.memory_space<vmem>>, vector<1x128xf32>
    %11 = vector.broadcast %10 : vector<1x128xf32> to vector<16x128xf32>
    %12 = arith.addf %9, %11 : vector<16x128xf32>
    %13 = arith.negf %12 : vector<16x128xf32>
    %14 = math.exp %13 : vector<16x128xf32>
    %cst_11 = arith.constant 1.000000e+00 : f32
    %15 = vector.broadcast %cst_11 : f32 to vector<16x128xf32>
    %16 = arith.addf %15, %14 : vector<16x128xf32>
    %17 = arith.divf %15, %16 : vector<16x128xf32>
    %c0_12 = arith.constant 0 : index
    %c0_13 = arith.constant 0 : index
    %18 = vector.load %arg6[%c0_12, %c0_13] : memref<16x128xf32, #tpu.memory_space<vmem>>, vector<16x128xf32>
    tpu.vector_store %arg6[%c0_12, %c0_13], %17 {strides = array<i32>} : memref<16x128xf32, #tpu.memory_space<vmem>>, vector<16x128xf32>,
    return
  }
  func.func @transform_0(%arg0: i32) -> (i32, i32) {
    %c0_i32 = arith.constant 0 : i32
    %c0_i32_0 = arith.constant 0 : i32
    return %arg0, %c0_i32 : i32, i32
  }
  func.func @transform_1(%arg0: i32) -> (i32, i32) {
    %c0_i32 = arith.constant 0 : i32
    %c0_i32_0 = arith.constant 0 : i32
    %c0_i32_1 = arith.constant 0 : i32
    return %c0_i32, %c0_i32_0 : i32, i32
  }
  func.func @transform_2(%arg0: i32) -> (i32, i32) {
    %c0_i32 = arith.constant 0 : i32
    %c0_i32_0 = arith.constant 0 : i32
    %c0_i32_1 = arith.constant 0 : i32
    return %c0_i32, %c0_i32_0 : i32, i32
  }
  func.func @transform_3(%arg0: i32) -> (i32, i32) {
    %c0_i32 = arith.constant 0 : i32
    %c0_i32_0 = arith.constant 0 : i32
    %c0_i32_1 = arith.constant 0 : i32
    return %c0_i32, %c0_i32_0 : i32, i32
  }
  func.func @transform_4(%arg0: i32) -> (i32, i32) {
    %c0_i32 = arith.constant 0 : i32
    %c0_i32_0 = arith.constant 0 : i32
    %c0_i32_1 = arith.constant 0 : i32
    return %c0_i32, %c0_i32_0 : i32, i32
  }
  func.func @transform_5(%arg0: i32) -> (i32, i32) {
    %c0_i32 = arith.constant 0 : i32
    %c0_i32_0 = arith.constant 0 : i32
    return %arg0, %c0_i32 : i32, i32
  }
}

</mosaic_0001>

<bundles_post_ra>
// kernel: binary_cell_states_forward.1
= control target key start
LH: loop header
LB: loop body
LE: loop exit
PB: predicated region body
PF: predicated region fallthrough
CT: control target
= control target key end

     0   :  { %vm35_vm0 = vcmask 1041408   ;;  %vm28_vm1 = vcmask 80896   ;;  %vm72_vm2 = vcmask 261120   ;;  %s235_s1 = inlined_call_operand.vmem [shape: f32[10,32], index: 1, kind: input, shape index: {}]   ;;  %s236_s0 = inlined_call_operand.vmem [shape: f32[16,10], index: 0, kind: input, shape index: {}]   ;;  %s237_s3 = inlined_call_operand.vmem [shape: f32[32,128], index: 3, kind: input, shape index: {}]   ;;  %s238_s2 = inlined_call_operand.vmem [shape: f32[1,32], index: 2, kind: input, shape index: {}]   ;;  %s239_s4 = inlined_call_operand.vmem [shape: f32[1,128], index: 4, kind: input, shape index: {}]   ;;  %s240_s5 = inlined_call_operand.vmem [shape: f32[16,128], index: 5, kind: output, shape index: {}]  }
   0x1   :  { %v23_v0 = vld [vmem:[%s235_s1 + $0x8] sm:$0x3]  ;;  %v22_v1 = vld [vmem:[%s235_s1] sm:$0xff]  ;;  %v67_v4 = vld [vmem:[%s237_s3 + $0x18] sm:$0xff] }
   0x2   :  { %v20_v2 = vld [vmem:[%s236_s0] sm:$0xff]  ;;  %146 = vmatpush.msk.msra.mxu0 %vm35_vm0, %v23_v0  ;;  %153 = vmatpush.msk.msra.mxu3 %vm35_vm0, %v23_v0  ;;  %v21_v3 = vld [vmem:[%s236_s0 + $0x8] sm:$0xff]  ;;  %v66_v5 = vld [vmem:[%s237_s3 + $0x10] sm:$0xff] }
   0x3   :  { %91 = vmatpush.msra.mxu1 %v67_v4  ;;  %155 = vmatpush.msra.mxu2 %v67_v4  ;;  %v65_v6 = vld [vmem:[%s237_s3 + $0x8] sm:$0xff]  ;;  %v64_v7 = vld [vmem:[%s237_s3] sm:$0xff] }
   0x4   :  { %54 = vmatpush.msra.mxu0 %v22_v1  ;;  %154 = vmatpush.msra.mxu3 %v22_v1  ;;  %v159_v8 = vld [vmem:[%s238_s2] ss:$0 sm:$0xff] }
   0x5   :  { %147 = vmatmul.msk.f32.vlgmr.msra.gmra.mxu0 %vm28_vm1, %v20_v2  ;;  %148 = vmatmul.msk.f32.vlgmr.msra.gmra.mxu3 %vm28_vm1, %v21_v3  ;;  %v160_v15 = vld [vmem:[%s239_s4] ss:$0 sm:$0xff] }
   0x6   :  { %92 = vmatpush.msra.mxu1 %v66_v5  ;;  %156 = vmatpush.msra.mxu2 %v66_v5 }
   0x8   :  { %93 = vmatpush.msra.mxu1 %v65_v6  ;;  %157 = vmatpush.msra.mxu2 %v65_v6 }
   0xa   :  { %94 = vmatpush.msra.mxu1 %v64_v7  ;;  %158 = vmatpush.msra.mxu2 %v64_v7 }
  0x82   :  { %v56_v9 = vpop.f32.mrf.mxu0 }
  0x83   :  { %v57_v10 = vadd.f32 %v159_v8, %v56_v9 }
  0x85   :  { %v62_v11 = vmax.f32 %v57_v10, 0.0 }
  0x87   :  { %149 = vmatmul.msk.f32.vlgmr.msra.gmra.mxu1 %vm72_vm2, %v62_v11 }
  0x88   :  { %v59_v12 = vpop.f32.mrf.mxu3 }
  0x89   :  { %v60_v13 = vadd.f32 %v159_v8, %v59_v12 }
  0x8b   :  { %v63_v14 = vmax.f32 %v60_v13, 0.0 }
  0x8d   :  { %150 = vmatmul.msk.f32.vlgmr.msra.gmra.mxu2 %vm72_vm2, %v63_v14 }
 0x104   :  { %v96_v16 = vpop.f32.mrf.mxu1 }
 0x105   :  { %v97_v17 = vadd.f32 %v160_v15, %v96_v16 }
 0x107   :  { %v151_v18 = vmul.f32 -1.442695, %v97_v17 }
 0x109   :  { %161 = vpow2.f32 %v151_v18 }
 0x10f   :  { %v162_v19 = vpop.eup %161 }
 0x110   :  { %v108_v20 = vadd.f32 1.0, %v162_v19  ;;  %v99_v21 = vpop.f32.mrf.mxu2 }
 0x111   :  { %v100_v22 = vadd.f32 %v160_v15, %v99_v21 }
 0x112   :  { %163 = vrcp.f32 %v108_v20  ;;  %v121_v26 = vand.u32 2147483648, %v108_v20  ;;  %vm115_vm3 = vweird.f32 %v108_v20  ;;  %v119_v29 = vand.u32 2147483647, %v108_v20 }
 0x113   :  { %v152_v23 = vmul.f32 -1.442695, %v100_v22 }
 0x114   :  { %v122_v32 = vor.u32 1.1754944e-38, %v121_v26  ;;  %vm120_vm6 = vcmp.eq.f32.partialorder %v119_v29, 8.507059e+37 }
 0x115   :  { %165 = vpow2.f32 %v152_v23 }
 0x118   :  { %v164_v24 = vpop.eup %163 }
 0x119   :  { %v111_v25 = vmul.f32 %v164_v24, %v108_v20  ;;  %vm116_vm4 = vweird.f32 %v164_v24 }
 0x11a   :  { %vm117_vm5 = vmor %vm115_vm3, %vm116_vm4 }
 0x11b   :  { %v166_v27 = vpop.eup %165  ;;  %v112_v28 = vsub.f32 1.0, %v111_v25 }
 0x11c   :  { %v109_v30 = vadd.f32 1.0, %v166_v27 }
 0x11d   :  { %v113_v31 = vmul.f32 %v164_v24, %v112_v28 }
 0x11e   :  { %167 = vrcp.f32 %v109_v30  ;;  %v136_v39 = vand.u32 2147483648, %v109_v30  ;;  %v134_v41 = vand.u32 2147483647, %v109_v30  ;;  %vm130_vm8 = vweird.f32 %v109_v30 }
 0x11f   :  { %v114_v33 = vadd.f32 %v164_v24, %v113_v31 }
 0x120   :  { %v137_v43 = vor.u32 1.1754944e-38, %v136_v39  ;;  %vm135_vm10 = vcmp.eq.f32.partialorder %v134_v41, 8.507059e+37 }
 0x121   :  { %v118_v34 = vsel %vm117_vm5, %v164_v24, %v114_v33 }
 0x122   :  { %v123_v35 = vsel %vm120_vm6, %v122_v32, %v118_v34 }
 0x123   :  { %140 = vst [vmem:[%s240_s5] sm:$0xff] %v123_v35 }
 0x124   :  { %v168_v36 = vpop.eup %167 }
 0x125   :  { %v126_v37 = vmul.f32 %v168_v36, %v109_v30  ;;  %vm131_vm7 = vweird.f32 %v168_v36 }
 0x126   :  { %vm132_vm9 = vmor %vm130_vm8, %vm131_vm7 }
 0x127   :  { %v127_v38 = vsub.f32 1.0, %v126_v37 }
 0x129   :  { %v128_v40 = vmul.f32 %v168_v36, %v127_v38 }
 0x12b   :  { %v129_v42 = vadd.f32 %v168_v36, %v128_v40 }
 0x12d   :  { %v133_v44 = vsel %vm132_vm9, %v168_v36, %v129_v42 }
 0x12e   :  { %v138_v45 = vsel %vm135_vm10, %v137_v43, %v133_v44 }
 0x12f   :  { %141 = vst [vmem:[%s240_s5 + $0x8] sm:$0xff] %v138_v45 }

</bundles_post_ra>
